<compile_context>
chip_gen: v6e
topology: v6e:2x2x1
jax: 0.10.0
libtpu: 0.0.40
codegen_flags: <defaults>
</compile_context>

<pallas_src>
import functools

import jax
import jax.numpy as jnp
from jax.experimental import pallas as pl
from jax.experimental.pallas import tpu as pltpu


def _round_up(x, m):
    return ((x + m - 1) // m) * m


# ---------------------------------------------------------------------------
# Kernel: fused 4-layer MLP (sigmoid) + row-wise L2 normalize.
# ---------------------------------------------------------------------------
def _mlp_norm_kernel(x_ref,
                     w1_ref, b1_ref,
                     w2_ref, b2_ref,
                     w3_ref, b3_ref,
                     w4_ref, b4_ref,
                     o_ref, *, act_dtype):
    mm = w1_ref.dtype                       # matmul operand dtype (bf16 or f32)

    # x arrives straight from HBM as f32; cast on the VPU (no wrapper pass).
    x = x_ref[...].astype(mm)

    def layer(h, w_ref, b_ref):
        acc = jnp.dot(h, w_ref[...], preferred_element_type=jnp.float32) + b_ref[...]
        # bf16 sigmoid on v6e/v7x (doubles EUP throughput, output is already
        # the next matmul operand dtype); f32 on v5e / f32 path.
        return jax.nn.sigmoid(acc.astype(act_dtype)).astype(mm)

    h = layer(x, w1_ref, b1_ref)
    h = layer(h, w2_ref, b2_ref)
    h = layer(h, w3_ref, b3_ref)
    y = jnp.dot(h, w4_ref[...], preferred_element_type=jnp.float32) + b4_ref[...]

    # F.normalize(y, p=2, dim=1):  y / max(||y||_2, eps)
    #   == y * rsqrt(max(sum(y^2), eps^2))   (single EUP rsqrt; eps=1e-12)
    sumsq = jnp.sum(y * y, axis=1, keepdims=True)
    inv_norm = jax.lax.rsqrt(jnp.maximum(sumsq, 1e-24))
    o_ref[...] = (y * inv_norm).astype(o_ref.dtype)


# ---------------------------------------------------------------------------
# Parameter packing (done once, outside the per-call path)
# ---------------------------------------------------------------------------
def pack_params(params, matmul_dtype=jnp.bfloat16):
    """Pad + cast weights once.  params: w1..w4 as (in, out), b1..b4 as (1, out)."""
    n_input = params["w1"].shape[0]
    n_hidden = params["w1"].shape[1]
    n_out = params["w4"].shape[1]
    n_hid_p = _round_up(n_hidden, 128)
    n_out_p = _round_up(n_out, 128)

    def pad2(a, rows, cols, dtype):
        a = a.astype(dtype)
        return jnp.pad(a, ((0, rows - a.shape[0]), (0, cols - a.shape[1])))

    packed = {
        "w1": pad2(params["w1"], n_input, n_hid_p, matmul_dtype),
        "b1": pad2(params["b1"], 1, n_hid_p, jnp.float32),
        "w2": pad2(params["w2"], n_hid_p, n_hid_p, matmul_dtype),
        "b2": pad2(params["b2"], 1, n_hid_p, jnp.float32),
        "w3": pad2(params["w3"], n_hid_p, n_hid_p, matmul_dtype),
        "b3": pad2(params["b3"], 1, n_hid_p, jnp.float32),
        "w4": pad2(params["w4"], n_hid_p, n_out_p, matmul_dtype),
        "b4": pad2(params["b4"], 1, n_out_p, jnp.float32),
    }
    meta = {"n_input": n_input, "n_out": n_out,
            "n_hid_p": n_hid_p, "n_out_p": n_out_p,
            "matmul_dtype": matmul_dtype}
    return packed, meta


# ---------------------------------------------------------------------------
# Wrapper
# ---------------------------------------------------------------------------
def _choose_batch_tile(B):
    # Grid is a sequential loop on one TensorCore (v5e/v6e): a single step for
    # small/moderate B avoids per-step overhead and re-sweeping resident
    # weights.  Large B uses 512-row tiles (multiple "parallel" steps also let
    # v7x's two TensorCores split the batch axis).
    if B <= 512:
        return _round_up(max(B, 16), 16)
    return 512


def _default_act_dtype(matmul_dtype):
    if matmul_dtype != jnp.bfloat16:
        return jnp.float32
    try:
        kind = jax.devices()[0].device_kind.lower()
        if "v5e" in kind or "v5 lite" in kind or "v5lite" in kind:
            return jnp.float32          # v5e has no bf16 VPU/EUP
    except Exception:
        pass
    return jnp.bfloat16


def team_embedding_forward(x, packed, meta, *, batch_tile=None,
                           out_dtype=jnp.float32, act_dtype=None):
    """x: (B, n_input) float32.  packed/meta from pack_params()."""
    B, n_input = x.shape
    assert n_input == meta["n_input"]
    n_hid_p, n_out_p, n_out = meta["n_hid_p"], meta["n_out_p"], meta["n_out"]
    mm_dtype = meta["matmul_dtype"]

    if act_dtype is None:
        act_dtype = _default_act_dtype(mm_dtype)
    if batch_tile is None:
        batch_tile = _choose_batch_tile(B)
    # Multiple of 16 for bf16 sublane packing / MXU M-efficiency.
    batch_tile = _round_up(max(batch_tile, 8),
                           16 if mm_dtype == jnp.bfloat16 else 8)
    grid = (pl.cdiv(B, batch_tile),)        # last block may overhang; OOB stores masked

    mm_bytes = jnp.dtype(mm_dtype).itemsize
    out_bytes = jnp.dtype(out_dtype).itemsize
    w_elems = n_input * n_hid_p + 2 * n_hid_p * n_hid_p + n_hid_p * n_out_p
    bias_bytes = (3 * n_hid_p + n_out_p) * 4

    cost = pl.CostEstimate(
        flops=2 * B * w_elems,
        transcendentals=B * (3 * n_hid_p + 1),
        bytes_accessed=(B * n_input * 4            # x (streamed f32)
                        + w_elems * mm_bytes       # weights
                        + bias_bytes               # biases
                        + B * n_out_p * out_bytes))  # output

    kernel = functools.partial(_mlp_norm_kernel, act_dtype=act_dtype)

    # TODO(synk): for n_hid_p >= ~2048 on v7x (64 MiB VMEM/TC), tile W2/W3/W4
    # along the hidden-out dim (extra grid axis or pltpu.emit_pipeline) instead
    # of holding full square weights resident.
    def build(single_buffer_weights):
        def const_spec(shape):
            idx = lambda i: (0, 0)
            if single_buffer_weights:
                return pl.BlockSpec(shape, idx, pipeline_mode=pl.Buffered(1))
            return pl.BlockSpec(shape, idx)

        in_specs = [
            pl.BlockSpec((batch_tile, n_input), lambda i: (i, 0)),   # x (batch-tiled)
            const_spec((n_input, n_hid_p)), const_spec((1, n_hid_p)),  # layer 1
            const_spec((n_hid_p, n_hid_p)), const_spec((1, n_hid_p)),  # layer 2
            const_spec((n_hid_p, n_hid_p)), const_spec((1, n_hid_p)),  # layer 3
            const_spec((n_hid_p, n_out_p)), const_spec((1, n_out_p)),  # layer 4
        ]
        out_spec = pl.BlockSpec((batch_tile, n_out_p), lambda i: (i, 0))

        # Explicit VMEM budget: weights (x1 or x2 buffers) + biases +
        # double-buffered x/out tiles + f32/bf16 activation scratch, + headroom.
        w_buf = 1 if single_buffer_weights else 2
        resident = (w_buf * w_elems * mm_bytes
                    + w_buf * bias_bytes
                    + 2 * batch_tile * (n_input * 4 + n_out_p * out_bytes)
                    + 6 * batch_tile * n_hid_p * 4)
        vmem_limit = int(1.25 * resident) + (2 << 20)
        vmem_limit = min(max(vmem_limit, 8 << 20), 64 << 20)

        return pl.pallas_call(
            kernel,
            out_shape=jax.ShapeDtypeStruct((B, n_out_p), out_dtype),
            grid_spec=pltpu.PrefetchScalarGridSpec(
                num_scalar_prefetch=0,
                grid=grid,
                in_specs=in_specs,
                out_specs=out_spec,
            ),
            compiler_params=pltpu.CompilerParams(
                dimension_semantics=("parallel",),
                vmem_limit_bytes=vmem_limit),
            cost_estimate=cost,
        )

    args = (x, packed["w1"], packed["b1"], packed["w2"], packed["b2"],
            packed["w3"], packed["b3"], packed["w4"], packed["b4"])
    try:
        out_padded = build(single_buffer_weights=True)(*args)
    except Exception:
        # Fallback for JAX versions without BlockSpec(pipeline_mode=pl.Buffered(1)).
        out_padded = build(single_buffer_weights=False)(*args)

    return out_padded[:, :n_out]


# ---------------------------------------------------------------------------
# Params / reference
# ---------------------------------------------------------------------------
def init_params(key, n_input, n_out):
    """nn.Linear-style init (uniform(-1/sqrt(fan_in), +)); weights as (in, out)."""
    n_hidden = n_input * 2
    dims = [(n_input, n_hidden), (n_hidden, n_hidden),
            (n_hidden, n_hidden), (n_hidden, n_out)]
    params = {}
    for idx, (fan_in, fan_out) in enumerate(dims, start=1):
        key, kw, kb = jax.random.split(key, 3)
        bound = 1.0 / jnp.sqrt(fan_in)
        params[f"w{idx}"] = jax.random.uniform(
            kw, (fan_in, fan_out), jnp.float32, -bound, bound)
        params[f"b{idx}"] = jax.random.uniform(
            kb, (1, fan_out), jnp.float32, -bound, bound)
    return params


def reference_forward(x, params):
    h = jax.nn.sigmoid(x @ params["w1"] + params["b1"])
    h = jax.nn.sigmoid(h @ params["w2"] + params["b2"])
    h = jax.nn.sigmoid(h @ params["w3"] + params["b3"])
    y = h @ params["w4"] + params["b4"]
    norm = jnp.sqrt(jnp.sum(y * y, axis=1, keepdims=True))
    return y / jnp.maximum(norm, 1e-12)


# ---------------------------------------------------------------------------
# Test
# ---------------------------------------------------------------------------
if __name__ == "__main__":
    n_input, n_out, batch = 32, 16, 16
    key = jax.random.PRNGKey(0)
    key, kx = jax.random.split(key)

    params = init_params(key, n_input, n_out)
    x = jax.random.normal(kx, (batch, n_input), jnp.float32)

    ref = reference_forward(x, params)

    # f32-matmul path: faithful to the (f32) PyTorch module.
    packed_f32, meta_f32 = pack_params(params, matmul_dtype=jnp.float32)
    out_f32 = jax.block_until_ready(team_embedding_forward(x, packed_f32, meta_f32))
    assert out_f32.shape == (batch, n_out)
    assert jnp.allclose(out_f32, ref, atol=1e-4, rtol=1e-4), "f32 mismatch vs reference"
    assert jnp.allclose(jnp.linalg.norm(out_f32, axis=1), 1.0, atol=1e-4)

    # Default bf16-operand path (MXU-native, f32 accumulation, f32 normalize).
    packed_bf16, meta_bf16 = pack_params(params)   # bf16 pack, hoisted out of the call path
    out_bf16 = jax.block_until_ready(team_embedding_forward(x, packed_bf16, meta_bf16))
    assert out_bf16.shape == (batch, n_out)
    assert jnp.allclose(out_bf16, ref, atol=4e-2, rtol=4e-2), "bf16 mismatch vs reference"
    assert jnp.allclose(jnp.linalg.norm(out_bf16, axis=1), 1.0, atol=1e-3)

    print("KERNEL_OK")
</pallas_src>

<mosaic_0001>
module attributes {stable_mosaic.version = 11 : i64} {
  func.func @_mlp_norm_kernel(%arg0: i32, %arg1: memref<16x32xf32, #tpu.memory_space<vmem>>, %arg2: memref<32x128xf32, #tpu.memory_space<vmem>>, %arg3: memref<1x128xf32, #tpu.memory_space<vmem>>, %arg4: memref<128x128xf32, #tpu.memory_space<vmem>>, %arg5: memref<1x128xf32, #tpu.memory_space<vmem>>, %arg6: memref<128x128xf32, #tpu.memory_space<vmem>>, %arg7: memref<1x128xf32, #tpu.memory_space<vmem>>, %arg8: memref<128x128xf32, #tpu.memory_space<vmem>>, %arg9: memref<1x128xf32, #tpu.memory_space<vmem>>, %arg10: memref<16x128xf32, #tpu.memory_space<vmem>>) attributes {dimension_semantics = [#tpu.dimension_semantics<parallel>], iteration_bounds = array<i64: 1>, scalar_prefetch = 0 : i64, scratch_operands = 0 : i64, tpu.core_type = #tpu.core_type<tc>, window_params = [{transform_indices = @transform_0, window_bounds = array<i64: 16, 32>}, {pipeline_mode = #tpu.pipeline_mode<synchronous>, transform_indices = @transform_1, window_bounds = array<i64: 32, 128>}, {pipeline_mode = #tpu.pipeline_mode<synchronous>, transform_indices = @transform_2, window_bounds = array<i64: 1, 128>}, {pipeline_mode = #tpu.pipeline_mode<synchronous>, transform_indices = @transform_3, window_bounds = array<i64: 128, 128>}, {pipeline_mode = #tpu.pipeline_mode<synchronous>, transform_indices = @transform_4, window_bounds = array<i64: 1, 128>}, {pipeline_mode = #tpu.pipeline_mode<synchronous>, transform_indices = @transform_5, window_bounds = array<i64: 128, 128>}, {pipeline_mode = #tpu.pipeline_mode<synchronous>, transform_indices = @transform_6, window_bounds = array<i64: 1, 128>}, {pipeline_mode = #tpu.pipeline_mode<synchronous>, transform_indices = @transform_7, window_bounds = array<i64: 128, 128>}, {pipeline_mode = #tpu.pipeline_mode<synchronous>, transform_indices = @transform_8, window_bounds = array<i64: 1, 128>}, {transform_indices = @transform_9, window_bounds = array<i64: 16, 128>}]} {
    %c0 = arith.constant 0 : index
    %c0_0 = arith.constant 0 : index
    %0 = vector.load %arg1[%c0, %c0_0] : memref<16x32xf32, #tpu.memory_space<vmem>>, vector<16x32xf32>
    %c0_1 = arith.constant 0 : index
    %c0_2 = arith.constant 0 : index
    %1 = vector.load %arg2[%c0_1, %c0_2] : memref<32x128xf32, #tpu.memory_space<vmem>>, vector<32x128xf32>
    %cst = arith.constant dense<0.000000e+00> : vector<16x128xf32>
    %2 = tpu.matmul %0, %1, %cst {dimension_numbers = #tpu.dot_dimension_numbers<[1], [0], [0], [1], [0, 0, 1, 1], [], []>} : vector<16x32xf32>, vector<32x128xf32>, vector<16x128xf32> -> vector<16x128xf32>
    %c0_3 = arith.constant 0 : index
    %c0_4 = arith.constant 0 : index
    %3 = vector.load %arg3[%c0_3, %c0_4] : memref<1x128xf32, #tpu.memory_space<vmem>>, vector<1x128xf32>
    %4 = vector.broadcast %3 : vector<1x128xf32> to vector<16x128xf32>
    %5 = arith.addf %2, %4 : vector<16x128xf32>
    %6 = arith.negf %5 : vector<16x128xf32>
    %7 = math.exp %6 : vector<16x128xf32>
    %cst_5 = arith.constant 1.000000e+00 : f32
    %8 = vector.broadcast %cst_5 : f32 to vector<16x128xf32>
    %9 = arith.addf %8, %7 : vector<16x128xf32>
    %10 = arith.divf %8, %9 : vector<16x128xf32>
    %c0_6 = arith.constant 0 : index
    %c0_7 = arith.constant 0 : index
    %11 = vector.load %arg4[%c0_6, %c0_7] : memref<128x128xf32, #tpu.memory_space<vmem>>, vector<128x128xf32>
    %cst_8 = arith.constant dense<0.000000e+00> : vector<16x128xf32>
    %12 = tpu.matmul %10, %11, %cst_8 {dimension_numbers = #tpu.dot_dimension_numbers<[1], [0], [0], [1], [0, 0, 1, 1], [], []>} : vector<16x128xf32>, vector<128x128xf32>, vector<16x128xf32> -> vector<16x128xf32>
    %c0_9 = arith.constant 0 : index
    %c0_10 = arith.constant 0 : index
    %13 = vector.load %arg5[%c0_9, %c0_10] : memref<1x128xf32, #tpu.memory_space<vmem>>, vector<1x128xf32>
    %14 = vector.broadcast %13 : vector<1x128xf32> to vector<16x128xf32>
    %15 = arith.addf %12, %14 : vector<16x128xf32>
    %16 = arith.negf %15 : vector<16x128xf32>
    %17 = math.exp %16 : vector<16x128xf32>
    %cst_11 = arith.constant 1.000000e+00 : f32
    %18 = vector.broadcast %cst_11 : f32 to vector<16x128xf32>
    %19 = arith.addf %18, %17 : vector<16x128xf32>
    %20 = arith.divf %18, %19 : vector<16x128xf32>
    %c0_12 = arith.constant 0 : index
    %c0_13 = arith.constant 0 : index
    %21 = vector.load %arg6[%c0_12, %c0_13] : memref<128x128xf32, #tpu.memory_space<vmem>>, vector<128x128xf32>
    %cst_14 = arith.constant dense<0.000000e+00> : vector<16x128xf32>
    %22 = tpu.matmul %20, %21, %cst_14 {dimension_numbers = #tpu.dot_dimension_numbers<[1], [0], [0], [1], [0, 0, 1, 1], [], []>} : vector<16x128xf32>, vector<128x128xf32>, vector<16x128xf32> -> vector<16x128xf32>
    %c0_15 = arith.constant 0 : index
    %c0_16 = arith.constant 0 : index
    %23 = vector.load %arg7[%c0_15, %c0_16] : memref<1x128xf32, #tpu.memory_space<vmem>>, vector<1x128xf32>
    %24 = vector.broadcast %23 : vector<1x128xf32> to vector<16x128xf32>
    %25 = arith.addf %22, %24 : vector<16x128xf32>
    %26 = arith.negf %25 : vector<16x128xf32>
    %27 = math.exp %26 : vector<16x128xf32>
    %cst_17 = arith.constant 1.000000e+00 : f32
    %28 = vector.broadcast %cst_17 : f32 to vector<16x128xf32>
    %29 = arith.addf %28, %27 : vector<16x128xf32>
    %30 = arith.divf %28, %29 : vector<16x128xf32>
    %c0_18 = arith.constant 0 : index
    %c0_19 = arith.constant 0 : index
    %31 = vector.load %arg8[%c0_18, %c0_19] : memref<128x128xf32, #tpu.memory_space<vmem>>, vector<128x128xf32>
    %cst_20 = arith.constant dense<0.000000e+00> : vector<16x128xf32>
    %32 = tpu.matmul %30, %31, %cst_20 {dimension_numbers = #tpu.dot_dimension_numbers<[1], [0], [0], [1], [0, 0, 1, 1], [], []>} : vector<16x128xf32>, vector<128x128xf32>, vector<16x128xf32> -> vector<16x128xf32>
    %c0_21 = arith.constant 0 : index
    %c0_22 = arith.constant 0 : index
    %33 = vector.load %arg9[%c0_21, %c0_22] : memref<1x128xf32, #tpu.memory_space<vmem>>, vector<1x128xf32>
    %34 = vector.broadcast %33 : vector<1x128xf32> to vector<16x128xf32>
    %35 = arith.addf %32, %34 : vector<16x128xf32>
    %36 = arith.mulf %35, %35 : vector<16x128xf32>
    %cst_23 = arith.constant dense<0.000000e+00> : vector<16xf32>
    %37 = vector.multi_reduction <add>, %36, %cst_23 [1] : vector<16x128xf32> to vector<16xf32>
    %38 = vector.shape_cast %37 : vector<16xf32> to vector<16x1xf32>
    %cst_24 = arith.constant 1.000000e-24 : f32
    %39 = vector.broadcast %cst_24 : f32 to vector<16x1xf32>
    %40 = arith.maximumf %38, %39 : vector<16x1xf32>
    %41 = math.rsqrt %40 : vector<16x1xf32>
    %42 = vector.broadcast %41 : vector<16x1xf32> to vector<16x128xf32>
    %43 = arith.mulf %35, %42 : vector<16x128xf32>
    %c0_25 = arith.constant 0 : index
    %c0_26 = arith.constant 0 : index
    %44 = vector.load %arg10[%c0_25, %c0_26] : memref<16x128xf32, #tpu.memory_space<vmem>>, vector<16x128xf32>
    tpu.vector_store %arg10[%c0_25, %c0_26], %43 {strides = array<i32>} : memref<16x128xf32, #tpu.memory_space<vmem>>, vector<16x128xf32>,
    return
  }
  func.func @transform_0(%arg0: i32) -> (i32, i32) {
    %c0_i32 = arith.constant 0 : i32
    %c0_i32_0 = arith.constant 0 : i32
    return %arg0, %c0_i32 : i32, i32
  }
  func.func @transform_1(%arg0: i32) -> (i32, i32) {
    %c0_i32 = arith.constant 0 : i32
    %c0_i32_0 = arith.constant 0 : i32
    %c0_i32_1 = arith.constant 0 : i32
    return %c0_i32, %c0_i32_0 : i32, i32
  }
  func.func @transform_2(%arg0: i32) -> (i32, i32) {
    %c0_i32 = arith.constant 0 : i32
    %c0_i32_0 = arith.constant 0 : i32
    %c0_i32_1 = arith.constant 0 : i32
    return %c0_i32, %c0_i32_0 : i32, i32
  }
  func.func @transform_3(%arg0: i32) -> (i32, i32) {
    %c0_i32 = arith.constant 0 : i32
    %c0_i32_0 = arith.constant 0 : i32
    %c0_i32_1 = arith.constant 0 : i32
    return %c0_i32, %c0_i32_0 : i32, i32
  }
  func.func @transform_4(%arg0: i32) -> (i32, i32) {
    %c0_i32 = arith.constant 0 : i32
    %c0_i32_0 = arith.constant 0 : i32
    %c0_i32_1 = arith.constant 0 : i32
    return %c0_i32, %c0_i32_0 : i32, i32
  }
  func.func @transform_5(%arg0: i32) -> (i32, i32) {
    %c0_i32 = arith.constant 0 : i32
    %c0_i32_0 = arith.constant 0 : i32
    %c0_i32_1 = arith.constant 0 : i32
    return %c0_i32, %c0_i32_0 : i32, i32
  }
  func.func @transform_6(%arg0: i32) -> (i32, i32) {
    %c0_i32 = arith.constant 0 : i32
    %c0_i32_0 = arith.constant 0 : i32
    %c0_i32_1 = arith.constant 0 : i32
    return %c0_i32, %c0_i32_0 : i32, i32
  }
  func.func @transform_7(%arg0: i32) -> (i32, i32) {
    %c0_i32 = arith.constant 0 : i32
    %c0_i32_0 = arith.constant 0 : i32
    %c0_i32_1 = arith.constant 0 : i32
    return %c0_i32, %c0_i32_0 : i32, i32
  }
  func.func @transform_8(%arg0: i32) -> (i32, i32) {
    %c0_i32 = arith.constant 0 : i32
    %c0_i32_0 = arith.constant 0 : i32
    %c0_i32_1 = arith.constant 0 : i32
    return %c0_i32, %c0_i32_0 : i32, i32
  }
  func.func @transform_9(%arg0: i32) -> (i32, i32) {
    %c0_i32 = arith.constant 0 : i32
    %c0_i32_0 = arith.constant 0 : i32
    return %arg0, %c0_i32 : i32, i32
  }
}

module attributes {stable_mosaic.version = 11 : i64} {
  func.func @_mlp_norm_kernel(%arg0: i32, %arg1: memref<16x32xf32, #tpu.memory_space<vmem>>, %arg2: memref<32x128xf32, #tpu.memory_space<vmem>>, %arg3: memref<1x128xf32, #tpu.memory_space<vmem>>, %arg4: memref<128x128xf32, #tpu.memory_space<vmem>>, %arg5: memref<1x128xf32, #tpu.memory_space<vmem>>, %arg6: memref<128x128xf32, #tpu.memory_space<vmem>>, %arg7: memref<1x128xf32, #tpu.memory_space<vmem>>, %arg8: memref<128x128xf32, #tpu.memory_space<vmem>>, %arg9: memref<1x128xf32, #tpu.memory_space<vmem>>, %arg10: memref<16x128xf32, #tpu.memory_space<vmem>>) attributes {dimension_semantics = [#tpu.dimension_semantics<parallel>], iteration_bounds = array<i64: 1>, scalar_prefetch = 0 : i64, scratch_operands = 0 : i64, tpu.core_type = #tpu.core_type<tc>, window_params = [{transform_indices = @transform_0, window_bounds = array<i64: 16, 32>}, {pipeline_mode = #tpu.pipeline_mode<synchronous>, transform_indices = @transform_1, window_bounds = array<i64: 32, 128>}, {pipeline_mode = #tpu.pipeline_mode<synchronous>, transform_indices = @transform_2, window_bounds = array<i64: 1, 128>}, {pipeline_mode = #tpu.pipeline_mode<synchronous>, transform_indices = @transform_3, window_bounds = array<i64: 128, 128>}, {pipeline_mode = #tpu.pipeline_mode<synchronous>, transform_indices = @transform_4, window_bounds = array<i64: 1, 128>}, {pipeline_mode = #tpu.pipeline_mode<synchronous>, transform_indices = @transform_5, window_bounds = array<i64: 128, 128>}, {pipeline_mode = #tpu.pipeline_mode<synchronous>, transform_indices = @transform_6, window_bounds = array<i64: 1, 128>}, {pipeline_mode = #tpu.pipeline_mode<synchronous>, transform_indices = @transform_7, window_bounds = array<i64: 128, 128>}, {pipeline_mode = #tpu.pipeline_mode<synchronous>, transform_indices = @transform_8, window_bounds = array<i64: 1, 128>}, {transform_indices = @transform_9, window_bounds = array<i64: 16, 128>}]} {
    %c0 = arith.constant 0 : index
    %c0_0 = arith.constant 0 : index
    %0 = vector.load %arg1[%c0, %c0_0] : memref<16x32xf32, #tpu.memory_space<vmem>>, vector<16x32xf32>
    %c0_1 = arith.constant 0 : index
    %c0_2 = arith.constant 0 : index
    %1 = vector.load %arg2[%c0_1, %c0_2] : memref<32x128xf32, #tpu.memory_space<vmem>>, vector<32x128xf32>
    %cst = arith.constant dense<0.000000e+00> : vector<16x128xf32>
    %2 = tpu.matmul %0, %1, %cst {dimension_numbers = #tpu.dot_dimension_numbers<[1], [0], [0], [1], [0, 0, 1, 1], [], []>} : vector<16x32xf32>, vector<32x128xf32>, vector<16x128xf32> -> vector<16x128xf32>
    %c0_3 = arith.constant 0 : index
    %c0_4 = arith.constant 0 : index
    %3 = vector.load %arg3[%c0_3, %c0_4] : memref<1x128xf32, #tpu.memory_space<vmem>>, vector<1x128xf32>
    %4 = vector.broadcast %3 : vector<1x128xf32> to vector<16x128xf32>
    %5 = arith.addf %2, %4 : vector<16x128xf32>
    %6 = arith.negf %5 : vector<16x128xf32>
    %7 = math.exp %6 : vector<16x128xf32>
    %cst_5 = arith.constant 1.000000e+00 : f32
    %8 = vector.broadcast %cst_5 : f32 to vector<16x128xf32>
    %9 = arith.addf %8, %7 : vector<16x128xf32>
    %10 = arith.divf %8, %9 : vector<16x128xf32>
    %c0_6 = arith.constant 0 : index
    %c0_7 = arith.constant 0 : index
    %11 = vector.load %arg4[%c0_6, %c0_7] : memref<128x128xf32, #tpu.memory_space<vmem>>, vector<128x128xf32>
    %cst_8 = arith.constant dense<0.000000e+00> : vector<16x128xf32>
    %12 = tpu.matmul %10, %11, %cst_8 {dimension_numbers = #tpu.dot_dimension_numbers<[1], [0], [0], [1], [0, 0, 1, 1], [], []>} : vector<16x128xf32>, vector<128x128xf32>, vector<16x128xf32> -> vector<16x128xf32>
    %c0_9 = arith.constant 0 : index
    %c0_10 = arith.constant 0 : index
    %13 = vector.load %arg5[%c0_9, %c0_10] : memref<1x128xf32, #tpu.memory_space<vmem>>, vector<1x128xf32>
    %14 = vector.broadcast %13 : vector<1x128xf32> to vector<16x128xf32>
    %15 = arith.addf %12, %14 : vector<16x128xf32>
    %16 = arith.negf %15 : vector<16x128xf32>
    %17 = math.exp %16 : vector<16x128xf32>
    %cst_11 = arith.constant 1.000000e+00 : f32
    %18 = vector.broadcast %cst_11 : f32 to vector<16x128xf32>
    %19 = arith.addf %18, %17 : vector<16x128xf32>
    %20 = arith.divf %18, %19 : vector<16x128xf32>
    %c0_12 = arith.constant 0 : index
    %c0_13 = arith.constant 0 : index
    %21 = vector.load %arg6[%c0_12, %c0_13] : memref<128x128xf32, #tpu.memory_space<vmem>>, vector<128x128xf32>
    %cst_14 = arith.constant dense<0.000000e+00> : vector<16x128xf32>
    %22 = tpu.matmul %20, %21, %cst_14 {dimension_numbers = #tpu.dot_dimension_numbers<[1], [0], [0], [1], [0, 0, 1, 1], [], []>} : vector<16x128xf32>, vector<128x128xf32>, vector<16x128xf32> -> vector<16x128xf32>
    %c0_15 = arith.constant 0 : index
    %c0_16 = arith.constant 0 : index
    %23 = vector.load %arg7[%c0_15, %c0_16] : memref<1x128xf32, #tpu.memory_space<vmem>>, vector<1x128xf32>
    %24 = vector.broadcast %23 : vector<1x128xf32> to vector<16x128xf32>
    %25 = arith.addf %22, %24 : vector<16x128xf32>
    %26 = arith.negf %25 : vector<16x128xf32>
    %27 = math.exp %26 : vector<16x128xf32>
    %cst_17 = arith.constant 1.000000e+00 : f32
    %28 = vector.broadcast %cst_17 : f32 to vector<16x128xf32>
    %29 = arith.addf %28, %27 : vector<16x128xf32>
    %30 = arith.divf %28, %29 : vector<16x128xf32>
    %c0_18 = arith.constant 0 : index
    %c0_19 = arith.constant 0 : index
    %31 = vector.load %arg8[%c0_18, %c0_19] : memref<128x128xf32, #tpu.memory_space<vmem>>, vector<128x128xf32>
    %cst_20 = arith.constant dense<0.000000e+00> : vector<16x128xf32>
    %32 = tpu.matmul %30, %31, %cst_20 {dimension_numbers = #tpu.dot_dimension_numbers<[1], [0], [0], [1], [0, 0, 1, 1], [], []>} : vector<16x128xf32>, vector<128x128xf32>, vector<16x128xf32> -> vector<16x128xf32>
    %c0_21 = arith.constant 0 : index
    %c0_22 = arith.constant 0 : index
    %33 = vector.load %arg9[%c0_21, %c0_22] : memref<1x128xf32, #tpu.memory_space<vmem>>, vector<1x128xf32>
    %34 = vector.broadcast %33 : vector<1x128xf32> to vector<16x128xf32>
    %35 = arith.addf %32, %34 : vector<16x128xf32>
    %36 = arith.mulf %35, %35 : vector<16x128xf32>
    %cst_23 = arith.constant dense<0.000000e+00> : vector<16xf32>
    %37 = vector.multi_reduction <add>, %36, %cst_23 [1] : vector<16x128xf32> to vector<16xf32>
    %38 = vector.shape_cast %37 : vector<16xf32> to vector<16x1xf32>
    %cst_24 = arith.constant 1.000000e-24 : f32
    %39 = vector.broadcast %cst_24 : f32 to vector<16x1xf32>
    %40 = arith.maximumf %38, %39 : vector<16x1xf32>
    %41 = math.rsqrt %40 : vector<16x1xf32>
    %42 = vector.broadcast %41 : vector<16x1xf32> to vector<16x128xf32>
    %43 = arith.mulf %35, %42 : vector<16x128xf32>
    %c0_25 = arith.constant 0 : index
    %c0_26 = arith.constant 0 : index
    %44 = vector.load %arg10[%c0_25, %c0_26] : memref<16x128xf32, #tpu.memory_space<vmem>>, vector<16x128xf32>
    tpu.vector_store %arg10[%c0_25, %c0_26], %43 {strides = array<i32>} : memref<16x128xf32, #tpu.memory_space<vmem>>, vector<16x128xf32>,
    return
  }
  func.func @transform_0(%arg0: i32) -> (i32, i32) {
    %c0_i32 = arith.constant 0 : i32
    %c0_i32_0 = arith.constant 0 : i32
    return %arg0, %c0_i32 : i32, i32
  }
  func.func @transform_1(%arg0: i32) -> (i32, i32) {
    %c0_i32 = arith.constant 0 : i32
    %c0_i32_0 = arith.constant 0 : i32
    %c0_i32_1 = arith.constant 0 : i32
    return %c0_i32, %c0_i32_0 : i32, i32
  }
  func.func @transform_2(%arg0: i32) -> (i32, i32) {
    %c0_i32 = arith.constant 0 : i32
    %c0_i32_0 = arith.constant 0 : i32
    %c0_i32_1 = arith.constant 0 : i32
    return %c0_i32, %c0_i32_0 : i32, i32
  }
  func.func @transform_3(%arg0: i32) -> (i32, i32) {
    %c0_i32 = arith.constant 0 : i32
    %c0_i32_0 = arith.constant 0 : i32
    %c0_i32_1 = arith.constant 0 : i32
    return %c0_i32, %c0_i32_0 : i32, i32
  }
  func.func @transform_4(%arg0: i32) -> (i32, i32) {
    %c0_i32 = arith.constant 0 : i32
    %c0_i32_0 = arith.constant 0 : i32
    %c0_i32_1 = arith.constant 0 : i32
    return %c0_i32, %c0_i32_0 : i32, i32
  }
  func.func @transform_5(%arg0: i32) -> (i32, i32) {
    %c0_i32 = arith.constant 0 : i32
    %c0_i32_0 = arith.constant 0 : i32
    %c0_i32_1 = arith.constant 0 : i32
    return %c0_i32, %c0_i32_0 : i32, i32
  }
  func.func @transform_6(%arg0: i32) -> (i32, i32) {
    %c0_i32 = arith.constant 0 : i32
    %c0_i32_0 = arith.constant 0 : i32
    %c0_i32_1 = arith.constant 0 : i32
    return %c0_i32, %c0_i32_0 : i32, i32
  }
  func.func @transform_7(%arg0: i32) -> (i32, i32) {
    %c0_i32 = arith.constant 0 : i32
    %c0_i32_0 = arith.constant 0 : i32
    %c0_i32_1 = arith.constant 0 : i32
    return %c0_i32, %c0_i32_0 : i32, i32
  }
  func.func @transform_8(%arg0: i32) -> (i32, i32) {
    %c0_i32 = arith.constant 0 : i32
    %c0_i32_0 = arith.constant 0 : i32
    %c0_i32_1 = arith.constant 0 : i32
    return %c0_i32, %c0_i32_0 : i32, i32
  }
  func.func @transform_9(%arg0: i32) -> (i32, i32) {
    %c0_i32 = arith.constant 0 : i32
    %c0_i32_0 = arith.constant 0 : i32
    return %arg0, %c0_i32 : i32, i32
  }
}

</mosaic_0001>

<bundles_post_ra>
// kernel: tpu_custom_call.1
= control target key start
LH: loop header
LB: loop body
LE: loop exit
PB: predicated region body
PF: predicated region fallthrough
CT: control target
= control target key end

     0   :  { %14 = vsyncpa [#allocation3], 0  ;;  %s1019_s0 = inlined_call_operand.hbm [shape: f32[16,32], index: 0, kind: input, shape index: {}]   ;;  %s1020_s1 = inlined_call_operand.hbm [shape: f32[32,128], index: 1, kind: input, shape index: {}]   ;;  %s1021_s2 = inlined_call_operand.vmem [shape: f32[1,128], index: 2, kind: input, shape index: {}]   ;;  %s1022_s3 = inlined_call_operand.hbm [shape: f32[128,128], index: 3, kind: input, shape index: {}]   ;;  %s1023_s4 = inlined_call_operand.vmem [shape: f32[1,128], index: 4, kind: input, shape index: {}]   ;;  %s1024_s5 = inlined_call_operand.hbm [shape: f32[128,128], index: 5, kind: input, shape index: {}]   ;;  %s1025_s6 = inlined_call_operand.vmem [shape: f32[1,128], index: 6, kind: input, shape index: {}]   ;;  %s1026_s7 = inlined_call_operand.hbm [shape: f32[128,128], index: 7, kind: input, shape index: {}]   ;;  %s1027_s8 = inlined_call_operand.vmem [shape: f32[1,128], index: 8, kind: input, shape index: {}]   ;;  %s1028_s9 = inlined_call_operand.hbm [shape: f32[16,128], index: 9, kind: output, shape index: {}]  }
   0x1   :  { %15 = vsyncpa [#allocation6], 0 }
   0x2   :  { %16 = vsyncpa [#allocation9], 0 }
   0x3   :  { %17 = vsyncpa [#allocation4], 0  ;;  %s911_s30 = smov [#allocation5]   ;;  %s912_s11 = smov [#allocation8]  }
   0x4   :  { %s35_s10 = sshll.u32 %s911_s30, 4  ;;  %s63_s12 = sshll.u32 %s912_s11, 4  ;;  %s36_s10 = int_to_ptr.vmem [resolvable:$true] %s35_s10  ;;  %s64_s12 = int_to_ptr.vmem [resolvable:$true] %s63_s12 }
   0x5   :  { %s791_s13 = scalar_lea.vmem %s36_s10, 512  ;;  %p796_p1 = scmp.lt.s32.totalorder %s36_s10, %s36_s10 }
   0x6   :  { %p792_p0 = scmp.ne.s32.totalorder %s36_s10, %s791_s13  ;;  %p797_p2 = scmp.lt.s32.totalorder %s791_s13, %s791_s13 }
   0x8   :  { %p798_p3 = por %p797_p2, %p796_p1 }
   0xa   :  { %p799_p4 = pnand %p798_p3, %p792_p0 }
   0xc   :  { %802 = shalt.err (!%p799_p4)
}
   0xd   :  { %s913_s14 = smov 128   ;;  %s914_s15 = smov 8  }
   0xe   :  { %41 = dma.hbm_to_vmem [thread:$0]  %s1020_s1, 512, %s36_s10, [#allocation6], %s913_s14, %s913_s14, %s914_s15  }
   0xf   :  { %s811_s18 = scalar_lea.vmem %s64_s12, 2048  ;;  %p816_p6 = scmp.lt.s32.totalorder %s64_s12, %s64_s12 }
  0x10   :  { %p812_p5 = scmp.ne.s32.totalorder %s64_s12, %s811_s18  ;;  %p817_p7 = scmp.lt.s32.totalorder %s811_s18, %s811_s18 }
  0x12   :  { %p818_p8 = por %p817_p7, %p816_p6 }
  0x14   :  { %p819_p9 = pnand %p818_p8, %p812_p5 }
  0x16   :  { %822 = shalt.err (!%p819_p9)
}
  0x17   :  { %69 = dma.hbm_to_vmem [thread:$0]  %s1024_s5, 2048, %s64_s12, [#allocation9], %s913_s14, %s913_s14, %s914_s15  }
  0x18   :  { %s915_s21 = smov [#allocation2]   ;;  %s916_s23 = smov [#allocation7]  }
  0x19   :  { %s23_s22 = sshll.u32 %s915_s21, 4  ;;  %s49_s24 = sshll.u32 %s916_s23, 4  ;;  %s24_s22 = int_to_ptr.vmem [resolvable:$true] %s23_s22  ;;  %s50_s24 = int_to_ptr.vmem [resolvable:$true] %s49_s24 }
  0x1a   :  { %s831_s1 = scalar_lea.vmem %s24_s22, 256  ;;  %p836_p11 = scmp.lt.s32.totalorder %s24_s22, %s24_s22 }
  0x1b   :  { %p832_p10 = scmp.ne.s32.totalorder %s24_s22, %s831_s1  ;;  %p837_p12 = scmp.lt.s32.totalorder %s831_s1, %s831_s1 }
  0x1d   :  { %p838_p13 = por %p837_p12, %p836_p11 }
  0x1f   :  { %p839_p0 = pnand %p838_p13, %p832_p10 }
  0x21   :  { %842 = shalt.err (!%p839_p0)
}
  0x22   :  { %29 = dma.hbm_to_vmem [thread:$0]  %s1019_s0, 256, %s24_s22, [#allocation3], %s913_s14, %s913_s14, %s914_s15  }
  0x23   :  { %s851_s5 = scalar_lea.vmem %s50_s24, 2048  ;;  %p856_p2 = scmp.lt.s32.totalorder %s50_s24, %s50_s24 }
  0x24   :  { %p852_p1 = scmp.ne.s32.totalorder %s50_s24, %s851_s5  ;;  %p857_p3 = scmp.lt.s32.totalorder %s851_s5, %s851_s5 }
  0x26   :  { %p858_p4 = por %p857_p3, %p856_p2 }
  0x28   :  { %p859_p5 = pnand %p858_p4, %p852_p1 }
  0x2a   :  { %862 = shalt.err (!%p859_p5)
}
  0x2b   :  { %55 = dma.hbm_to_vmem [thread:$0]  %s1022_s3, 2048, %s50_s24, [#allocation6], %s913_s14, %s913_s14, %s914_s15  }
  0x2c   :  { %s917_s29 = smov [#allocation10]  }
  0x2d   :  { %s77_s30 = sshll.u32 %s917_s29, 4  ;;  %s78_s30 = int_to_ptr.vmem [resolvable:$true] %s77_s30 }
  0x2e   :  { %s871_s10 = scalar_lea.vmem %s78_s30, 2048  ;;  %p876_p7 = scmp.lt.s32.totalorder %s78_s30, %s78_s30 }
  0x2f   :  { %p872_p6 = scmp.ne.s32.totalorder %s78_s30, %s871_s10  ;;  %p877_p8 = scmp.lt.s32.totalorder %s871_s10, %s871_s10 }
  0x31   :  { %p878_p9 = por %p877_p8, %p876_p7 }
  0x33   :  { %p879_p10 = pnand %p878_p9, %p872_p6 }
  0x35   :  { %882 = shalt.err (!%p879_p10)
}
  0x36   :  { %83 = dma.hbm_to_vmem [thread:$0]  %s1026_s7, 2048, %s78_s30, [#allocation9], %s913_s14, %s913_s14, %s914_s15  }
  0x37   :  { %903 = dma.done.wait [#allocation3], 256  }
  0x38   :  { %904 = vsyncadd [#allocation3], 4294967040 }
  0x39   :  { %905 = dma.done.wait [#allocation6], 2560  }
  0x3a   :  { %906 = vsyncadd [#allocation6], 4294964736 }
  0x3b   :  { %907 = dma.done.wait [#allocation9], 4096  }
  0x3c   :  { %908 = vsyncadd [#allocation9], 4294963200  ;;  %vm114_vm0 = vcmask 261120   ;;  %v106_v0 = vld [vmem:[#allocation5 + $0x18] sm:$0xff]  ;;  %v105_v1 = vld [vmem:[#allocation5 + $0x10] sm:$0xff]  ;;  %s918_s17 = smov [#allocation11]  }
  0x3d   :  { %631 = vmatprep.subr.mxu0 %v106_v0  ;;  %v101_v2 = vld [vmem:[#allocation2] sm:$0xff]  ;;  %v104_v3 = vld [vmem:[#allocation5 + $0x8] sm:$0xff]  ;;  %v103_v4 = vld [vmem:[#allocation5] sm:$0xff]  ;;  %s545_s18 = sshll.u32 %s918_s17, 4  ;;  %s546_s18 = int_to_ptr.vmem [resolvable:$true] %s545_s18 }
  0x3e   :  { %632 = vmatpush3.msra.mxu0 %v106_v0  ;;  %639 = vmatprep.mubr.msk.f32.mxu0 %vm114_vm0, %v101_v2  ;;  %v102_v5 = vld [vmem:[#allocation2 + $0x8] sm:$0xff]  ;;  %v222_v7 = vld [vmem:[#allocation7 + $0x70] sm:$0xff]  ;;  %v221_v8 = vld [vmem:[#allocation7 + $0x68] sm:$0xff]  ;;  %p888_p12 = scmp.lt.s32.totalorder %s546_s18, %s546_s18 }
  0x3f   :  { %633 = vmatprep.subr.mxu0 %v105_v1  ;;  %v223_v6 = vld [vmem:[#allocation7 + $0x78] sm:$0xff]  ;;  %v220_v9 = vld [vmem:[#allocation7 + $0x60] sm:$0xff]  ;;  %v218_v11 = vld [vmem:[#allocation7 + $0x50] sm:$0xff] }
  0x40   :  { %634 = vmatpush3.msra.mxu0 %v105_v1  ;;  %642 = vmatprep.subr.mxu1 %v223_v6  ;;  %v219_v10 = vld [vmem:[#allocation7 + $0x58] sm:$0xff]  ;;  %v217_v12 = vld [vmem:[#allocation7 + $0x48] sm:$0xff]  ;;  %v216_v13 = vld [vmem:[#allocation7 + $0x40] sm:$0xff] }
  0x41   :  { %635 = vmatprep.subr.mxu0 %v104_v3  ;;  %643 = vmatpush3.msra.mxu1 %v223_v6  ;;  %v215_v14 = vld [vmem:[#allocation7 + $0x38] sm:$0xff]  ;;  %v214_v15 = vld [vmem:[#allocation7 + $0x30] sm:$0xff]  ;;  %v213_v16 = vld [vmem:[#allocation7 + $0x28] sm:$0xff] }
  0x42   :  { %636 = vmatpush3.msra.mxu0 %v104_v3  ;;  %644 = vmatprep.subr.mxu1 %v222_v7  ;;  %v212_v17 = vld [vmem:[#allocation7 + $0x20] sm:$0xff]  ;;  %v211_v18 = vld [vmem:[#allocation7 + $0x18] sm:$0xff]  ;;  %v210_v19 = vld [vmem:[#allocation7 + $0x10] sm:$0xff] }
  0x43   :  { %637 = vmatprep.subr.mxu0 %v103_v4  ;;  %645 = vmatpush3.msra.mxu1 %v222_v7  ;;  %v209_v20 = vld [vmem:[#allocation7 + $0x8] sm:$0xff]  ;;  %v208_v21 = vld [vmem:[#allocation7] sm:$0xff]  ;;  %v559_v22 = vld [vmem:[%s1021_s2] ss:$0 sm:$0xff] }
  0x44   :  { %638 = vmatpush3.msra.mxu0 %v103_v4  ;;  %646 = vmatprep.subr.mxu1 %v221_v8  ;;  %v333_v35 = vld [vmem:[#allocation8 + $0x78] sm:$0xff]  ;;  %v332_v36 = vld [vmem:[#allocation8 + $0x70] sm:$0xff]  ;;  %v331_v37 = vld [vmem:[#allocation8 + $0x68] sm:$0xff] }
  0x45   :  { %640 = vmatmul.mubr.msk.f32.vlgmr.msra.gmra.mxu0 %vm114_vm0, %v102_v5  ;;  %647 = vmatpush3.msra.mxu1 %v221_v8  ;;  %v330_v38 = vld [vmem:[#allocation8 + $0x60] sm:$0xff]  ;;  %v329_v39 = vld [vmem:[#allocation8 + $0x58] sm:$0xff]  ;;  %v328_v40 = vld [vmem:[#allocation8 + $0x50] sm:$0xff] }
  0x46   :  { %648 = vmatprep.subr.mxu1 %v220_v9  ;;  %677 = vmatprep.subr.mxu0 %v333_v35  ;;  %v327_v41 = vld [vmem:[#allocation8 + $0x48] sm:$0xff]  ;;  %v326_v42 = vld [vmem:[#allocation8 + $0x40] sm:$0xff]  ;;  %v325_v43 = vld [vmem:[#allocation8 + $0x38] sm:$0xff] }
  0x47   :  { %649 = vmatpush3.msra.mxu1 %v220_v9  ;;  %678 = vmatpush3.msra.mxu0 %v333_v35  ;;  %v324_v44 = vld [vmem:[#allocation8 + $0x30] sm:$0xff]  ;;  %v323_v45 = vld [vmem:[#allocation8 + $0x28] sm:$0xff]  ;;  %v322_v46 = vld [vmem:[#allocation8 + $0x20] sm:$0xff] }
  0x48   :  { %650 = vmatprep.subr.mxu1 %v219_v10  ;;  %679 = vmatprep.subr.mxu0 %v332_v36  ;;  %v321_v47 = vld [vmem:[#allocation8 + $0x18] sm:$0xff]  ;;  %v320_v48 = vld [vmem:[#allocation8 + $0x10] sm:$0xff]  ;;  %v319_v49 = vld [vmem:[#allocation8 + $0x8] sm:$0xff] }
  0x49   :  { %651 = vmatpush3.msra.mxu1 %v219_v10  ;;  %680 = vmatpush3.msra.mxu0 %v332_v36  ;;  %v318_v50 = vld [vmem:[#allocation8] sm:$0xff]  ;;  %v564_v51 = vld [vmem:[%s1023_s4] ss:$0 sm:$0xff]  ;;  %v443_v0 = vld [vmem:[#allocation10 + $0x78] sm:$0xff] }
  0x4a   :  { %652 = vmatprep.subr.mxu1 %v218_v11  ;;  %681 = vmatprep.subr.mxu0 %v331_v37  ;;  %v442_v1 = vld [vmem:[#allocation10 + $0x70] sm:$0xff]  ;;  %v441_v2 = vld [vmem:[#allocation10 + $0x68] sm:$0xff]  ;;  %v440_v3 = vld [vmem:[#allocation10 + $0x60] sm:$0xff] }
  0x4b   :  { %653 = vmatpush3.msra.mxu1 %v218_v11  ;;  %682 = vmatpush3.msra.mxu0 %v331_v37  ;;  %v439_v4 = vld [vmem:[#allocation10 + $0x58] sm:$0xff]  ;;  %v438_v5 = vld [vmem:[#allocation10 + $0x50] sm:$0xff]  ;;  %v437_v6 = vld [vmem:[#allocation10 + $0x48] sm:$0xff] }
  0x4c   :  { %654 = vmatprep.subr.mxu1 %v217_v12  ;;  %683 = vmatprep.subr.mxu0 %v330_v38  ;;  %v436_v7 = vld [vmem:[#allocation10 + $0x40] sm:$0xff]  ;;  %v435_v8 = vld [vmem:[#allocation10 + $0x38] sm:$0xff]  ;;  %v434_v9 = vld [vmem:[#allocation10 + $0x30] sm:$0xff] }
  0x4d   :  { %655 = vmatpush3.msra.mxu1 %v217_v12  ;;  %684 = vmatpush3.msra.mxu0 %v330_v38  ;;  %v433_v10 = vld [vmem:[#allocation10 + $0x28] sm:$0xff]  ;;  %v432_v11 = vld [vmem:[#allocation10 + $0x20] sm:$0xff]  ;;  %v431_v12 = vld [vmem:[#allocation10 + $0x18] sm:$0xff] }
  0x4e   :  { %656 = vmatprep.subr.mxu1 %v216_v13  ;;  %685 = vmatprep.subr.mxu0 %v329_v39 }
  0x4f   :  { %657 = vmatpush3.msra.mxu1 %v216_v13  ;;  %686 = vmatpush3.msra.mxu0 %v329_v39  ;;  %v430_v13 = vld [vmem:[#allocation10 + $0x10] sm:$0xff] }
  0x50   :  { %658 = vmatprep.subr.mxu1 %v215_v14  ;;  %687 = vmatprep.subr.mxu0 %v328_v40 }
  0x51   :  { %659 = vmatpush3.msra.mxu1 %v215_v14  ;;  %688 = vmatpush3.msra.mxu0 %v328_v40  ;;  %v429_v14 = vld [vmem:[#allocation10 + $0x8] sm:$0xff] }
  0x52   :  { %660 = vmatprep.subr.mxu1 %v214_v15  ;;  %689 = vmatprep.subr.mxu0 %v327_v41 }
  0x53   :  { %661 = vmatpush3.msra.mxu1 %v214_v15  ;;  %690 = vmatpush3.msra.mxu0 %v327_v41  ;;  %v428_v15 = vld [vmem:[#allocation10] sm:$0xff] }
  0x54   :  { %662 = vmatprep.subr.mxu1 %v213_v16  ;;  %691 = vmatprep.subr.mxu0 %v326_v42 }
  0x55   :  { %663 = vmatpush3.msra.mxu1 %v213_v16  ;;  %692 = vmatpush3.msra.mxu0 %v326_v42  ;;  %v567_v16 = vld [vmem:[%s1025_s6] ss:$0 sm:$0xff] }
  0x56   :  { %664 = vmatprep.subr.mxu1 %v212_v17  ;;  %693 = vmatprep.subr.mxu0 %v325_v43 }
  0x57   :  { %665 = vmatpush3.msra.mxu1 %v212_v17  ;;  %694 = vmatpush3.msra.mxu0 %v325_v43 }
  0x58   :  { %666 = vmatprep.subr.mxu1 %v211_v18  ;;  %695 = vmatprep.subr.mxu0 %v324_v44 }
  0x59   :  { %667 = vmatpush3.msra.mxu1 %v211_v18  ;;  %696 = vmatpush3.msra.mxu0 %v324_v44 }
  0x5a   :  { %668 = vmatprep.subr.mxu1 %v210_v19  ;;  %697 = vmatprep.subr.mxu0 %v323_v45 }
  0x5b   :  { %669 = vmatpush3.msra.mxu1 %v210_v19  ;;  %698 = vmatpush3.msra.mxu0 %v323_v45 }
  0x5c   :  { %670 = vmatprep.subr.mxu1 %v209_v20  ;;  %699 = vmatprep.subr.mxu0 %v322_v46 }
  0x5d   :  { %671 = vmatpush3.msra.mxu1 %v209_v20  ;;  %700 = vmatpush3.msra.mxu0 %v322_v46 }
  0x5e   :  { %672 = vmatprep.subr.mxu1 %v208_v21  ;;  %701 = vmatprep.subr.mxu0 %v321_v47 }
  0x5f   :  { %673 = vmatpush3.msra.mxu1 %v208_v21  ;;  %702 = vmatpush3.msra.mxu0 %v321_v47 }
  0x60   :  { %703 = vmatprep.subr.mxu0 %v320_v48  ;;  %712 = vmatprep.subr.mxu1 %v443_v0 }
  0x61   :  { %704 = vmatpush3.msra.mxu0 %v320_v48 }
  0x62   :  { %705 = vmatprep.subr.mxu0 %v319_v49 }
  0x63   :  { %706 = vmatpush3.msra.mxu0 %v319_v49 }
  0x64   :  { %707 = vmatprep.subr.mxu0 %v318_v50 }
  0x65   :  { %708 = vmatpush3.msra.mxu0 %v318_v50 }
 0x105   :  { %v641_v23 = vpop.f32.mrf.mxu0 }
 0x106   :  { %v193_v24 = vadd.f32 %v641_v23, %v559_v22 }
 0x107   :  { %v187_v25 = vpop.f32.mrf.mxu0 }
 0x108   :  { %v563_v26 = vmul.f32 -1.442695, %v193_v24  ;;  %v188_v27 = vadd.f32 %v559_v22, %v187_v25 }
 0x10a   :  { %755 = vpow2.f32 %v563_v26  ;;  %v562_v28 = vmul.f32 -1.442695, %v188_v27 }
 0x10c   :  { %757 = vpow2.f32 %v562_v28 }
 0x117   :  { %v756_v29 = vpop.eup %755 }
 0x118   :  { %v203_v31 = vadd.f32 1.0, %v756_v29 }
 0x119   :  { %v758_v30 = vpop.eup %757 }
 0x11a   :  { %v202_v32 = vadd.f32 1.0, %v758_v30  ;;  %v570_v30 = vld [vmem:[%s1027_s8] ss:$0 sm:$0xff]  ;;  %s883_s8 = scalar_lea.vmem %s546_s18, 256 }
 0x11b   :  { %p884_p11 = scmp.ne.s32.totalorder %s546_s18, %s883_s8  ;;  %p889_p13 = scmp.lt.s32.totalorder %s883_s8, %s883_s8 }
 0x11c   :  { %759 = vrcp.f32 %v202_v32 }
 0x11d   :  { %761 = vrcp.f32 %v203_v31  ;;  %p890_p0 = por %p889_p13, %p888_p12 }
 0x11f   :  { %p891_p1 = pnand %p890_p0, %p884_p11 }
 0x129   :  { %v760_v33 = vpop.eup %759 }
 0x12a   :  { %v762_v34 = vpop.eup %761  ;;  %674 = vmatprep.mubr.f32.mxu1 %v760_v33 }
 0x12b   :  { %675 = vmatmul.mubr.f32.vlgmr.msra.gmra.mxu1 %v762_v34 }
 0x12c   :  { %713 = vmatpush3.msra.mxu1 %v443_v0 }
 0x12d   :  { %714 = vmatprep.subr.mxu1 %v442_v1 }
 0x12e   :  { %715 = vmatpush3.msra.mxu1 %v442_v1 }
 0x12f   :  { %716 = vmatprep.subr.mxu1 %v441_v2 }
 0x130   :  { %717 = vmatpush3.msra.mxu1 %v441_v2 }
 0x131   :  { %718 = vmatprep.subr.mxu1 %v440_v3 }
 0x132   :  { %719 = vmatpush3.msra.mxu1 %v440_v3 }
 0x133   :  { %720 = vmatprep.subr.mxu1 %v439_v4 }
 0x134   :  { %721 = vmatpush3.msra.mxu1 %v439_v4 }
 0x135   :  { %722 = vmatprep.subr.mxu1 %v438_v5 }
 0x136   :  { %723 = vmatpush3.msra.mxu1 %v438_v5 }
 0x137   :  { %724 = vmatprep.subr.mxu1 %v437_v6 }
 0x138   :  { %725 = vmatpush3.msra.mxu1 %v437_v6 }
 0x139   :  { %726 = vmatprep.subr.mxu1 %v436_v7 }
 0x13a   :  { %727 = vmatpush3.msra.mxu1 %v436_v7 }
 0x13b   :  { %728 = vmatprep.subr.mxu1 %v435_v8 }
 0x13c   :  { %729 = vmatpush3.msra.mxu1 %v435_v8 }
 0x13d   :  { %730 = vmatprep.subr.mxu1 %v434_v9 }
 0x13e   :  { %731 = vmatpush3.msra.mxu1 %v434_v9 }
 0x13f   :  { %732 = vmatprep.subr.mxu1 %v433_v10 }
 0x140   :  { %733 = vmatpush3.msra.mxu1 %v433_v10 }
 0x141   :  { %734 = vmatprep.subr.mxu1 %v432_v11 }
 0x142   :  { %735 = vmatpush3.msra.mxu1 %v432_v11 }
 0x143   :  { %736 = vmatprep.subr.mxu1 %v431_v12 }
 0x144   :  { %737 = vmatpush3.msra.mxu1 %v431_v12 }
 0x145   :  { %738 = vmatprep.subr.mxu1 %v430_v13 }
 0x146   :  { %739 = vmatpush3.msra.mxu1 %v430_v13 }
 0x147   :  { %740 = vmatprep.subr.mxu1 %v429_v14 }
 0x148   :  { %741 = vmatpush3.msra.mxu1 %v429_v14 }
 0x149   :  { %742 = vmatprep.subr.mxu1 %v428_v15 }
 0x14a   :  { %743 = vmatpush3.msra.mxu1 %v428_v15 }
 0x1eb   :  { %v676_v52 = vpop.f32.mrf.mxu1 }
 0x1ec   :  { %v303_v53 = vadd.f32 %v676_v52, %v564_v51 }
 0x1ed   :  { %v297_v54 = vpop.f32.mrf.mxu1 }
 0x1ee   :  { %v566_v55 = vmul.f32 -1.442695, %v303_v53  ;;  %v298_v56 = vadd.f32 %v564_v51, %v297_v54 }
 0x1f0   :  { %763 = vpow2.f32 %v566_v55  ;;  %v565_v57 = vmul.f32 -1.442695, %v298_v56 }
 0x1f2   :  { %765 = vpow2.f32 %v565_v57 }
 0x1fd   :  { %v764_v58 = vpop.eup %763 }
 0x1fe   :  { %v313_v60 = vadd.f32 1.0, %v764_v58 }
 0x1ff   :  { %v766_v59 = vpop.eup %765 }
 0x200   :  { %v312_v61 = vadd.f32 1.0, %v766_v59 }
 0x202   :  { %767 = vrcp.f32 %v312_v61 }
 0x203   :  { %769 = vrcp.f32 %v313_v60 }
 0x20f   :  { %v768_v62 = vpop.eup %767 }
 0x210   :  { %v770_v63 = vpop.eup %769  ;;  %709 = vmatprep.mubr.f32.mxu0 %v768_v62 }
 0x211   :  { %710 = vmatmul.mubr.f32.vlgmr.msra.gmra.mxu0 %v770_v63 }
 0x2d1   :  { %v711_v17 = vpop.f32.mrf.mxu0 }
 0x2d2   :  { %v413_v18 = vadd.f32 %v711_v17, %v567_v16 }
 0x2d3   :  { %v407_v19 = vpop.f32.mrf.mxu0 }
 0x2d4   :  { %v569_v20 = vmul.f32 -1.442695, %v413_v18  ;;  %v408_v21 = vadd.f32 %v567_v16, %v407_v19 }
 0x2d6   :  { %771 = vpow2.f32 %v569_v20  ;;  %v568_v22 = vmul.f32 -1.442695, %v408_v21 }
 0x2d8   :  { %773 = vpow2.f32 %v568_v22 }
 0x2e3   :  { %v772_v23 = vpop.eup %771 }
 0x2e4   :  { %v423_v25 = vadd.f32 1.0, %v772_v23 }
 0x2e5   :  { %v774_v24 = vpop.eup %773 }
 0x2e6   :  { %v422_v26 = vadd.f32 1.0, %v774_v24 }
 0x2e8   :  { %775 = vrcp.f32 %v422_v26 }
 0x2e9   :  { %777 = vrcp.f32 %v423_v25 }
 0x2f5   :  { %v776_v27 = vpop.eup %775 }
 0x2f6   :  { %v778_v28 = vpop.eup %777  ;;  %744 = vmatprep.mubr.f32.mxu1 %v776_v27 }
 0x2f7   :  { %745 = vmatmul.mubr.f32.vlgmr.msra.gmra.mxu1 %v778_v28 }
 0x3b7   :  { %v746_v29 = vpop.f32.mrf.mxu1 }
 0x3b8   :  { %v523_v33 = vadd.f32 %v746_v29, %v570_v30 }
 0x3b9   :  { %v517_v31 = vpop.f32.mrf.mxu1 }
 0x3ba   :  { %v518_v32 = vadd.f32 %v570_v30, %v517_v31  ;;  %v527_v35 = vmul.f32 %v523_v33, %v523_v33 }
 0x3bc   :  { %v526_v34 = vmul.f32 %v518_v32, %v518_v32 }
 0x3be   :  { %528 = vadd.xlane.f32.xlu0 %v526_v34 }
 0x3c2   :  { %530 = vadd.xlane.f32.xlu0 %v527_v35 }
 0x447   :  { %v529_v36 = vpop.xlane.xlu0 %528 }
 0x448   :  { %v532_v37 = vmax.f32 %v529_v36, 1e-24 }
 0x44a   :  { %779 = vrsqrt.f32 %v532_v37 }
 0x44b   :  { %v531_v38 = vpop.xlane.xlu0 %530 }
 0x44c   :  { %v533_v39 = vmax.f32 %v531_v38, 1e-24 }
 0x44e   :  { %781 = vrsqrt.f32 %v533_v39 }
 0x457   :  { %v780_v40 = vpop.eup %779 }
 0x458   :  { %v536_v41 = vmul.f32 %v780_v40, %v518_v32 }
 0x45a   :  { %538 = vst [vmem:[#allocation11] sm:$0xff] %v536_v41 }
 0x45b   :  { %v782_v42 = vpop.eup %781 }
 0x45c   :  { %v537_v43 = vmul.f32 %v782_v42, %v523_v33 }
 0x45e   :  { %539 = vst [vmem:[#allocation11 + $0x8] sm:$0xff] %v537_v43 }
 0x45f   :  { %894 = shalt.err (!%p891_p1)
}
 0x460   :  { %551 = dma.vmem_to_hbm [thread:$0]  %s546_s18, 256, %s1028_s9, [#allocation4], %s913_s14, %s913_s14, %s914_s15  }
 0x461   :  { %909 = dma.done.wait [#allocation4], 256  }
 0x462   :  { %910 = vsyncadd [#allocation4], 4294967040 }
 0x463   :  { %555 = vsyncpa [#allocation3], 1 }
 0x464   :  { %556 = vsyncpa [#allocation6], 1 }
 0x465   :  { %557 = vsyncpa [#allocation9], 1 }
 0x466   :  { %558 = vsyncpa [#allocation4], 1 }

// kernel: tpu_custom_call.1
= control target key start
LH: loop header
LB: loop body
LE: loop exit
PB: predicated region body
PF: predicated region fallthrough
CT: control target
= control target key end

     0   :  { %14 = vsyncpa [#allocation3], 0  ;;  %s1019_s0 = inlined_call_operand.hbm [shape: f32[16,32], index: 0, kind: input, shape index: {}]   ;;  %s1020_s1 = inlined_call_operand.hbm [shape: f32[32,128], index: 1, kind: input, shape index: {}]   ;;  %s1021_s2 = inlined_call_operand.vmem [shape: f32[1,128], index: 2, kind: input, shape index: {}]   ;;  %s1022_s3 = inlined_call_operand.hbm [shape: f32[128,128], index: 3, kind: input, shape index: {}]   ;;  %s1023_s4 = inlined_call_operand.vmem [shape: f32[1,128], index: 4, kind: input, shape index: {}]   ;;  %s1024_s5 = inlined_call_operand.hbm [shape: f32[128,128], index: 5, kind: input, shape index: {}]   ;;  %s1025_s6 = inlined_call_operand.vmem [shape: f32[1,128], index: 6, kind: input, shape index: {}]   ;;  %s1026_s7 = inlined_call_operand.hbm [shape: f32[128,128], index: 7, kind: input, shape index: {}]   ;;  %s1027_s8 = inlined_call_operand.vmem [shape: f32[1,128], index: 8, kind: input, shape index: {}]   ;;  %s1028_s9 = inlined_call_operand.hbm [shape: f32[16,128], index: 9, kind: output, shape index: {}]  }
   0x1   :  { %15 = vsyncpa [#allocation6], 0 }
   0x2   :  { %16 = vsyncpa [#allocation9], 0 }
   0x3   :  { %17 = vsyncpa [#allocation4], 0  ;;  %s911_s30 = smov [#allocation5]   ;;  %s912_s11 = smov [#allocation8]  }
   0x4   :  { %s35_s10 = sshll.u32 %s911_s30, 4  ;;  %s63_s12 = sshll.u32 %s912_s11, 4  ;;  %s36_s10 = int_to_ptr.vmem [resolvable:$true] %s35_s10  ;;  %s64_s12 = int_to_ptr.vmem [resolvable:$true] %s63_s12 }
   0x5   :  { %s791_s13 = scalar_lea.vmem %s36_s10, 512  ;;  %p796_p1 = scmp.lt.s32.totalorder %s36_s10, %s36_s10 }
   0x6   :  { %p792_p0 = scmp.ne.s32.totalorder %s36_s10, %s791_s13  ;;  %p797_p2 = scmp.lt.s32.totalorder %s791_s13, %s791_s13 }
   0x8   :  { %p798_p3 = por %p797_p2, %p796_p1 }
   0xa   :  { %p799_p4 = pnand %p798_p3, %p792_p0 }
   0xc   :  { %802 = shalt.err (!%p799_p4)
}
   0xd   :  { %s913_s14 = smov 128   ;;  %s914_s15 = smov 8  }
   0xe   :  { %41 = dma.hbm_to_vmem [thread:$0]  %s1020_s1, 512, %s36_s10, [#allocation6], %s913_s14, %s913_s14, %s914_s15  }
   0xf   :  { %s811_s18 = scalar_lea.vmem %s64_s12, 2048  ;;  %p816_p6 = scmp.lt.s32.totalorder %s64_s12, %s64_s12 }
  0x10   :  { %p812_p5 = scmp.ne.s32.totalorder %s64_s12, %s811_s18  ;;  %p817_p7 = scmp.lt.s32.totalorder %s811_s18, %s811_s18 }
  0x12   :  { %p818_p8 = por %p817_p7, %p816_p6 }
  0x14   :  { %p819_p9 = pnand %p818_p8, %p812_p5 }
  0x16   :  { %822 = shalt.err (!%p819_p9)
}
  0x17   :  { %69 = dma.hbm_to_vmem [thread:$0]  %s1024_s5, 2048, %s64_s12, [#allocation9], %s913_s14, %s913_s14, %s914_s15  }
  0x18   :  { %s915_s21 = smov [#allocation2]   ;;  %s916_s23 = smov [#allocation7]  }
  0x19   :  { %s23_s22 = sshll.u32 %s915_s21, 4  ;;  %s49_s24 = sshll.u32 %s916_s23, 4  ;;  %s24_s22 = int_to_ptr.vmem [resolvable:$true] %s23_s22  ;;  %s50_s24 = int_to_ptr.vmem [resolvable:$true] %s49_s24 }
  0x1a   :  { %s831_s1 = scalar_lea.vmem %s24_s22, 256  ;;  %p836_p11 = scmp.lt.s32.totalorder %s24_s22, %s24_s22 }
  0x1b   :  { %p832_p10 = scmp.ne.s32.totalorder %s24_s22, %s831_s1  ;;  %p837_p12 = scmp.lt.s32.totalorder %s831_s1, %s831_s1 }
  0x1d   :  { %p838_p13 = por %p837_p12, %p836_p11 }
  0x1f   :  { %p839_p0 = pnand %p838_p13, %p832_p10 }
  0x21   :  { %842 = shalt.err (!%p839_p0)
}
  0x22   :  { %29 = dma.hbm_to_vmem [thread:$0]  %s1019_s0, 256, %s24_s22, [#allocation3], %s913_s14, %s913_s14, %s914_s15  }
  0x23   :  { %s851_s5 = scalar_lea.vmem %s50_s24, 2048  ;;  %p856_p2 = scmp.lt.s32.totalorder %s50_s24, %s50_s24 }
  0x24   :  { %p852_p1 = scmp.ne.s32.totalorder %s50_s24, %s851_s5  ;;  %p857_p3 = scmp.lt.s32.totalorder %s851_s5, %s851_s5 }
  0x26   :  { %p858_p4 = por %p857_p3, %p856_p2 }
  0x28   :  { %p859_p5 = pnand %p858_p4, %p852_p1 }
  0x2a   :  { %862 = shalt.err (!%p859_p5)
}
  0x2b   :  { %55 = dma.hbm_to_vmem [thread:$0]  %s1022_s3, 2048, %s50_s24, [#allocation6], %s913_s14, %s913_s14, %s914_s15  }
  0x2c   :  { %s917_s29 = smov [#allocation10]  }
  0x2d   :  { %s77_s30 = sshll.u32 %s917_s29, 4  ;;  %s78_s30 = int_to_ptr.vmem [resolvable:$true] %s77_s30 }
  0x2e   :  { %s871_s10 = scalar_lea.vmem %s78_s30, 2048  ;;  %p876_p7 = scmp.lt.s32.totalorder %s78_s30, %s78_s30 }
  0x2f   :  { %p872_p6 = scmp.ne.s32.totalorder %s78_s30, %s871_s10  ;;  %p877_p8 = scmp.lt.s32.totalorder %s871_s10, %s871_s10 }
  0x31   :  { %p878_p9 = por %p877_p8, %p876_p7 }
  0x33   :  { %p879_p10 = pnand %p878_p9, %p872_p6 }
  0x35   :  { %882 = shalt.err (!%p879_p10)
}
  0x36   :  { %83 = dma.hbm_to_vmem [thread:$0]  %s1026_s7, 2048, %s78_s30, [#allocation9], %s913_s14, %s913_s14, %s914_s15  }
  0x37   :  { %903 = dma.done.wait [#allocation3], 256  }
  0x38   :  { %904 = vsyncadd [#allocation3], 4294967040 }
  0x39   :  { %905 = dma.done.wait [#allocation6], 2560  }
  0x3a   :  { %906 = vsyncadd [#allocation6], 4294964736 }
  0x3b   :  { %907 = dma.done.wait [#allocation9], 4096  }
  0x3c   :  { %908 = vsyncadd [#allocation9], 4294963200  ;;  %vm114_vm0 = vcmask 261120   ;;  %v106_v0 = vld [vmem:[#allocation5 + $0x18] sm:$0xff]  ;;  %v105_v1 = vld [vmem:[#allocation5 + $0x10] sm:$0xff]  ;;  %s918_s17 = smov [#allocation11]  }
  0x3d   :  { %631 = vmatprep.subr.mxu0 %v106_v0  ;;  %v101_v2 = vld [vmem:[#allocation2] sm:$0xff]  ;;  %v104_v3 = vld [vmem:[#allocation5 + $0x8] sm:$0xff]  ;;  %v103_v4 = vld [vmem:[#allocation5] sm:$0xff]  ;;  %s545_s18 = sshll.u32 %s918_s17, 4  ;;  %s546_s18 = int_to_ptr.vmem [resolvable:$true] %s545_s18 }
  0x3e   :  { %632 = vmatpush3.msra.mxu0 %v106_v0  ;;  %639 = vmatprep.mubr.msk.f32.mxu0 %vm114_vm0, %v101_v2  ;;  %v102_v5 = vld [vmem:[#allocation2 + $0x8] sm:$0xff]  ;;  %v222_v7 = vld [vmem:[#allocation7 + $0x70] sm:$0xff]  ;;  %v221_v8 = vld [vmem:[#allocation7 + $0x68] sm:$0xff]  ;;  %p888_p12 = scmp.lt.s32.totalorder %s546_s18, %s546_s18 }
  0x3f   :  { %633 = vmatprep.subr.mxu0 %v105_v1  ;;  %v223_v6 = vld [vmem:[#allocation7 + $0x78] sm:$0xff]  ;;  %v220_v9 = vld [vmem:[#allocation7 + $0x60] sm:$0xff]  ;;  %v218_v11 = vld [vmem:[#allocation7 + $0x50] sm:$0xff] }
  0x40   :  { %634 = vmatpush3.msra.mxu0 %v105_v1  ;;  %642 = vmatprep.subr.mxu1 %v223_v6  ;;  %v219_v10 = vld [vmem:[#allocation7 + $0x58] sm:$0xff]  ;;  %v217_v12 = vld [vmem:[#allocation7 + $0x48] sm:$0xff]  ;;  %v216_v13 = vld [vmem:[#allocation7 + $0x40] sm:$0xff] }
  0x41   :  { %635 = vmatprep.subr.mxu0 %v104_v3  ;;  %643 = vmatpush3.msra.mxu1 %v223_v6  ;;  %v215_v14 = vld [vmem:[#allocation7 + $0x38] sm:$0xff]  ;;  %v214_v15 = vld [vmem:[#allocation7 + $0x30] sm:$0xff]  ;;  %v213_v16 = vld [vmem:[#allocation7 + $0x28] sm:$0xff] }
  0x42   :  { %636 = vmatpush3.msra.mxu0 %v104_v3  ;;  %644 = vmatprep.subr.mxu1 %v222_v7  ;;  %v212_v17 = vld [vmem:[#allocation7 + $0x20] sm:$0xff]  ;;  %v211_v18 = vld [vmem:[#allocation7 + $0x18] sm:$0xff]  ;;  %v210_v19 = vld [vmem:[#allocation7 + $0x10] sm:$0xff] }
  0x43   :  { %637 = vmatprep.subr.mxu0 %v103_v4  ;;  %645 = vmatpush3.msra.mxu1 %v222_v7  ;;  %v209_v20 = vld [vmem:[#allocation7 + $0x8] sm:$0xff]  ;;  %v208_v21 = vld [vmem:[#allocation7] sm:$0xff]  ;;  %v559_v22 = vld [vmem:[%s1021_s2] ss:$0 sm:$0xff] }
  0x44   :  { %638 = vmatpush3.msra.mxu0 %v103_v4  ;;  %646 = vmatprep.subr.mxu1 %v221_v8  ;;  %v333_v35 = vld [vmem:[#allocation8 + $0x78] sm:$0xff]  ;;  %v332_v36 = vld [vmem:[#allocation8 + $0x70] sm:$0xff]  ;;  %v331_v37 = vld [vmem:[#allocation8 + $0x68] sm:$0xff] }
  0x45   :  { %640 = vmatmul.mubr.msk.f32.vlgmr.msra.gmra.mxu0 %vm114_vm0, %v102_v5  ;;  %647 = vmatpush3.msra.mxu1 %v221_v8  ;;  %v330_v38 = vld [vmem:[#allocation8 + $0x60] sm:$0xff]  ;;  %v329_v39 = vld [vmem:[#allocation8 + $0x58] sm:$0xff]  ;;  %v328_v40 = vld [vmem:[#allocation8 + $0x50] sm:$0xff] }
  0x46   :  { %648 = vmatprep.subr.mxu1 %v220_v9  ;;  %677 = vmatprep.subr.mxu0 %v333_v35  ;;  %v327_v41 = vld [vmem:[#allocation8 + $0x48] sm:$0xff]  ;;  %v326_v42 = vld [vmem:[#allocation8 + $0x40] sm:$0xff]  ;;  %v325_v43 = vld [vmem:[#allocation8 + $0x38] sm:$0xff] }
  0x47   :  { %649 = vmatpush3.msra.mxu1 %v220_v9  ;;  %678 = vmatpush3.msra.mxu0 %v333_v35  ;;  %v324_v44 = vld [vmem:[#allocation8 + $0x30] sm:$0xff]  ;;  %v323_v45 = vld [vmem:[#allocation8 + $0x28] sm:$0xff]  ;;  %v322_v46 = vld [vmem:[#allocation8 + $0x20] sm:$0xff] }
  0x48   :  { %650 = vmatprep.subr.mxu1 %v219_v10  ;;  %679 = vmatprep.subr.mxu0 %v332_v36  ;;  %v321_v47 = vld [vmem:[#allocation8 + $0x18] sm:$0xff]  ;;  %v320_v48 = vld [vmem:[#allocation8 + $0x10] sm:$0xff]  ;;  %v319_v49 = vld [vmem:[#allocation8 + $0x8] sm:$0xff] }
  0x49   :  { %651 = vmatpush3.msra.mxu1 %v219_v10  ;;  %680 = vmatpush3.msra.mxu0 %v332_v36  ;;  %v318_v50 = vld [vmem:[#allocation8] sm:$0xff]  ;;  %v564_v51 = vld [vmem:[%s1023_s4] ss:$0 sm:$0xff]  ;;  %v443_v0 = vld [vmem:[#allocation10 + $0x78] sm:$0xff] }
  0x4a   :  { %652 = vmatprep.subr.mxu1 %v218_v11  ;;  %681 = vmatprep.subr.mxu0 %v331_v37  ;;  %v442_v1 = vld [vmem:[#allocation10 + $0x70] sm:$0xff]  ;;  %v441_v2 = vld [vmem:[#allocation10 + $0x68] sm:$0xff]  ;;  %v440_v3 = vld [vmem:[#allocation10 + $0x60] sm:$0xff] }
  0x4b   :  { %653 = vmatpush3.msra.mxu1 %v218_v11  ;;  %682 = vmatpush3.msra.mxu0 %v331_v37  ;;  %v439_v4 = vld [vmem:[#allocation10 + $0x58] sm:$0xff]  ;;  %v438_v5 = vld [vmem:[#allocation10 + $0x50] sm:$0xff]  ;;  %v437_v6 = vld [vmem:[#allocation10 + $0x48] sm:$0xff] }
  0x4c   :  { %654 = vmatprep.subr.mxu1 %v217_v12  ;;  %683 = vmatprep.subr.mxu0 %v330_v38  ;;  %v436_v7 = vld [vmem:[#allocation10 + $0x40] sm:$0xff]  ;;  %v435_v8 = vld [vmem:[#allocation10 + $0x38] sm:$0xff]  ;;  %v434_v9 = vld [vmem:[#allocation10 + $0x30] sm:$0xff] }
  0x4d   :  { %655 = vmatpush3.msra.mxu1 %v217_v12  ;;  %684 = vmatpush3.msra.mxu0 %v330_v38  ;;  %v433_v10 = vld [vmem:[#allocation10 + $0x28] sm:$0xff]  ;;  %v432_v11 = vld [vmem:[#allocation10 + $0x20] sm:$0xff]  ;;  %v431_v12 = vld [vmem:[#allocation10 + $0x18] sm:$0xff] }
  0x4e   :  { %656 = vmatprep.subr.mxu1 %v216_v13  ;;  %685 = vmatprep.subr.mxu0 %v329_v39 }
  0x4f   :  { %657 = vmatpush3.msra.mxu1 %v216_v13  ;;  %686 = vmatpush3.msra.mxu0 %v329_v39  ;;  %v430_v13 = vld [vmem:[#allocation10 + $0x10] sm:$0xff] }
  0x50   :  { %658 = vmatprep.subr.mxu1 %v215_v14  ;;  %687 = vmatprep.subr.mxu0 %v328_v40 }
  0x51   :  { %659 = vmatpush3.msra.mxu1 %v215_v14  ;;  %688 = vmatpush3.msra.mxu0 %v328_v40  ;;  %v429_v14 = vld [vmem:[#allocation10 + $0x8] sm:$0xff] }
  0x52   :  { %660 = vmatprep.subr.mxu1 %v214_v15  ;;  %689 = vmatprep.subr.mxu0 %v327_v41 }
  0x53   :  { %661 = vmatpush3.msra.mxu1 %v214_v15  ;;  %690 = vmatpush3.msra.mxu0 %v327_v41  ;;  %v428_v15 = vld [vmem:[#allocation10] sm:$0xff] }
  0x54   :  { %662 = vmatprep.subr.mxu1 %v213_v16  ;;  %691 = vmatprep.subr.mxu0 %v326_v42 }
  0x55   :  { %663 = vmatpush3.msra.mxu1 %v213_v16  ;;  %692 = vmatpush3.msra.mxu0 %v326_v42  ;;  %v567_v16 = vld [vmem:[%s1025_s6] ss:$0 sm:$0xff] }
  0x56   :  { %664 = vmatprep.subr.mxu1 %v212_v17  ;;  %693 = vmatprep.subr.mxu0 %v325_v43 }
  0x57   :  { %665 = vmatpush3.msra.mxu1 %v212_v17  ;;  %694 = vmatpush3.msra.mxu0 %v325_v43 }
  0x58   :  { %666 = vmatprep.subr.mxu1 %v211_v18  ;;  %695 = vmatprep.subr.mxu0 %v324_v44 }
  0x59   :  { %667 = vmatpush3.msra.mxu1 %v211_v18  ;;  %696 = vmatpush3.msra.mxu0 %v324_v44 }
  0x5a   :  { %668 = vmatprep.subr.mxu1 %v210_v19  ;;  %697 = vmatprep.subr.mxu0 %v323_v45 }
  0x5b   :  { %669 = vmatpush3.msra.mxu1 %v210_v19  ;;  %698 = vmatpush3.msra.mxu0 %v323_v45 }
  0x5c   :  { %670 = vmatprep.subr.mxu1 %v209_v20  ;;  %699 = vmatprep.subr.mxu0 %v322_v46 }
  0x5d   :  { %671 = vmatpush3.msra.mxu1 %v209_v20  ;;  %700 = vmatpush3.msra.mxu0 %v322_v46 }
  0x5e   :  { %672 = vmatprep.subr.mxu1 %v208_v21  ;;  %701 = vmatprep.subr.mxu0 %v321_v47 }
  0x5f   :  { %673 = vmatpush3.msra.mxu1 %v208_v21  ;;  %702 = vmatpush3.msra.mxu0 %v321_v47 }
  0x60   :  { %703 = vmatprep.subr.mxu0 %v320_v48  ;;  %712 = vmatprep.subr.mxu1 %v443_v0 }
  0x61   :  { %704 = vmatpush3.msra.mxu0 %v320_v48 }
  0x62   :  { %705 = vmatprep.subr.mxu0 %v319_v49 }
  0x63   :  { %706 = vmatpush3.msra.mxu0 %v319_v49 }
  0x64   :  { %707 = vmatprep.subr.mxu0 %v318_v50 }
  0x65   :  { %708 = vmatpush3.msra.mxu0 %v318_v50 }
 0x105   :  { %v641_v23 = vpop.f32.mrf.mxu0 }
 0x106   :  { %v193_v24 = vadd.f32 %v641_v23, %v559_v22 }
 0x107   :  { %v187_v25 = vpop.f32.mrf.mxu0 }
 0x108   :  { %v563_v26 = vmul.f32 -1.442695, %v193_v24  ;;  %v188_v27 = vadd.f32 %v559_v22, %v187_v25 }
 0x10a   :  { %755 = vpow2.f32 %v563_v26  ;;  %v562_v28 = vmul.f32 -1.442695, %v188_v27 }
 0x10c   :  { %757 = vpow2.f32 %v562_v28 }
 0x117   :  { %v756_v29 = vpop.eup %755 }
 0x118   :  { %v203_v31 = vadd.f32 1.0, %v756_v29 }
 0x119   :  { %v758_v30 = vpop.eup %757 }
 0x11a   :  { %v202_v32 = vadd.f32 1.0, %v758_v30  ;;  %v570_v30 = vld [vmem:[%s1027_s8] ss:$0 sm:$0xff]  ;;  %s883_s8 = scalar_lea.vmem %s546_s18, 256 }
 0x11b   :  { %p884_p11 = scmp.ne.s32.totalorder %s546_s18, %s883_s8  ;;  %p889_p13 = scmp.lt.s32.totalorder %s883_s8, %s883_s8 }
 0x11c   :  { %759 = vrcp.f32 %v202_v32 }
 0x11d   :  { %761 = vrcp.f32 %v203_v31  ;;  %p890_p0 = por %p889_p13, %p888_p12 }
 0x11f   :  { %p891_p1 = pnand %p890_p0, %p884_p11 }
 0x129   :  { %v760_v33 = vpop.eup %759 }
 0x12a   :  { %v762_v34 = vpop.eup %761  ;;  %674 = vmatprep.mubr.f32.mxu1 %v760_v33 }
 0x12b   :  { %675 = vmatmul.mubr.f32.vlgmr.msra.gmra.mxu1 %v762_v34 }
 0x12c   :  { %713 = vmatpush3.msra.mxu1 %v443_v0 }
 0x12d   :  { %714 = vmatprep.subr.mxu1 %v442_v1 }
 0x12e   :  { %715 = vmatpush3.msra.mxu1 %v442_v1 }
 0x12f   :  { %716 = vmatprep.subr.mxu1 %v441_v2 }
 0x130   :  { %717 = vmatpush3.msra.mxu1 %v441_v2 }
 0x131   :  { %718 = vmatprep.subr.mxu1 %v440_v3 }
 0x132   :  { %719 = vmatpush3.msra.mxu1 %v440_v3 }
 0x133   :  { %720 = vmatprep.subr.mxu1 %v439_v4 }
 0x134   :  { %721 = vmatpush3.msra.mxu1 %v439_v4 }
 0x135   :  { %722 = vmatprep.subr.mxu1 %v438_v5 }
 0x136   :  { %723 = vmatpush3.msra.mxu1 %v438_v5 }
 0x137   :  { %724 = vmatprep.subr.mxu1 %v437_v6 }
 0x138   :  { %725 = vmatpush3.msra.mxu1 %v437_v6 }
 0x139   :  { %726 = vmatprep.subr.mxu1 %v436_v7 }
 0x13a   :  { %727 = vmatpush3.msra.mxu1 %v436_v7 }
 0x13b   :  { %728 = vmatprep.subr.mxu1 %v435_v8 }
 0x13c   :  { %729 = vmatpush3.msra.mxu1 %v435_v8 }
 0x13d   :  { %730 = vmatprep.subr.mxu1 %v434_v9 }
 0x13e   :  { %731 = vmatpush3.msra.mxu1 %v434_v9 }
 0x13f   :  { %732 = vmatprep.subr.mxu1 %v433_v10 }
 0x140   :  { %733 = vmatpush3.msra.mxu1 %v433_v10 }
 0x141   :  { %734 = vmatprep.subr.mxu1 %v432_v11 }
 0x142   :  { %735 = vmatpush3.msra.mxu1 %v432_v11 }
 0x143   :  { %736 = vmatprep.subr.mxu1 %v431_v12 }
 0x144   :  { %737 = vmatpush3.msra.mxu1 %v431_v12 }
 0x145   :  { %738 = vmatprep.subr.mxu1 %v430_v13 }
 0x146   :  { %739 = vmatpush3.msra.mxu1 %v430_v13 }
 0x147   :  { %740 = vmatprep.subr.mxu1 %v429_v14 }
 0x148   :  { %741 = vmatpush3.msra.mxu1 %v429_v14 }
 0x149   :  { %742 = vmatprep.subr.mxu1 %v428_v15 }
 0x14a   :  { %743 = vmatpush3.msra.mxu1 %v428_v15 }
 0x1eb   :  { %v676_v52 = vpop.f32.mrf.mxu1 }
 0x1ec   :  { %v303_v53 = vadd.f32 %v676_v52, %v564_v51 }
 0x1ed   :  { %v297_v54 = vpop.f32.mrf.mxu1 }
 0x1ee   :  { %v566_v55 = vmul.f32 -1.442695, %v303_v53  ;;  %v298_v56 = vadd.f32 %v564_v51, %v297_v54 }
 0x1f0   :  { %763 = vpow2.f32 %v566_v55  ;;  %v565_v57 = vmul.f32 -1.442695, %v298_v56 }
 0x1f2   :  { %765 = vpow2.f32 %v565_v57 }
 0x1fd   :  { %v764_v58 = vpop.eup %763 }
 0x1fe   :  { %v313_v60 = vadd.f32 1.0, %v764_v58 }
 0x1ff   :  { %v766_v59 = vpop.eup %765 }
 0x200   :  { %v312_v61 = vadd.f32 1.0, %v766_v59 }
 0x202   :  { %767 = vrcp.f32 %v312_v61 }
 0x203   :  { %769 = vrcp.f32 %v313_v60 }
 0x20f   :  { %v768_v62 = vpop.eup %767 }
 0x210   :  { %v770_v63 = vpop.eup %769  ;;  %709 = vmatprep.mubr.f32.mxu0 %v768_v62 }
 0x211   :  { %710 = vmatmul.mubr.f32.vlgmr.msra.gmra.mxu0 %v770_v63 }
 0x2d1   :  { %v711_v17 = vpop.f32.mrf.mxu0 }
 0x2d2   :  { %v413_v18 = vadd.f32 %v711_v17, %v567_v16 }
 0x2d3   :  { %v407_v19 = vpop.f32.mrf.mxu0 }
 0x2d4   :  { %v569_v20 = vmul.f32 -1.442695, %v413_v18  ;;  %v408_v21 = vadd.f32 %v567_v16, %v407_v19 }
 0x2d6   :  { %771 = vpow2.f32 %v569_v20  ;;  %v568_v22 = vmul.f32 -1.442695, %v408_v21 }
 0x2d8   :  { %773 = vpow2.f32 %v568_v22 }
 0x2e3   :  { %v772_v23 = vpop.eup %771 }
 0x2e4   :  { %v423_v25 = vadd.f32 1.0, %v772_v23 }
 0x2e5   :  { %v774_v24 = vpop.eup %773 }
 0x2e6   :  { %v422_v26 = vadd.f32 1.0, %v774_v24 }
 0x2e8   :  { %775 = vrcp.f32 %v422_v26 }
 0x2e9   :  { %777 = vrcp.f32 %v423_v25 }
 0x2f5   :  { %v776_v27 = vpop.eup %775 }
 0x2f6   :  { %v778_v28 = vpop.eup %777  ;;  %744 = vmatprep.mubr.f32.mxu1 %v776_v27 }
 0x2f7   :  { %745 = vmatmul.mubr.f32.vlgmr.msra.gmra.mxu1 %v778_v28 }
 0x3b7   :  { %v746_v29 = vpop.f32.mrf.mxu1 }
 0x3b8   :  { %v523_v33 = vadd.f32 %v746_v29, %v570_v30 }
 0x3b9   :  { %v517_v31 = vpop.f32.mrf.mxu1 }
 0x3ba   :  { %v518_v32 = vadd.f32 %v570_v30, %v517_v31  ;;  %v527_v35 = vmul.f32 %v523_v33, %v523_v33 }
 0x3bc   :  { %v526_v34 = vmul.f32 %v518_v32, %v518_v32 }
 0x3be   :  { %528 = vadd.xlane.f32.xlu0 %v526_v34 }
 0x3c2   :  { %530 = vadd.xlane.f32.xlu0 %v527_v35 }
 0x447   :  { %v529_v36 = vpop.xlane.xlu0 %528 }
 0x448   :  { %v532_v37 = vmax.f32 %v529_v36, 1e-24 }
 0x44a   :  { %779 = vrsqrt.f32 %v532_v37 }
 0x44b   :  { %v531_v38 = vpop.xlane.xlu0 %530 }
 0x44c   :  { %v533_v39 = vmax.f32 %v531_v38, 1e-24 }
 0x44e   :  { %781 = vrsqrt.f32 %v533_v39 }
 0x457   :  { %v780_v40 = vpop.eup %779 }
 0x458   :  { %v536_v41 = vmul.f32 %v780_v40, %v518_v32 }
 0x45a   :  { %538 = vst [vmem:[#allocation11] sm:$0xff] %v536_v41 }
 0x45b   :  { %v782_v42 = vpop.eup %781 }
 0x45c   :  { %v537_v43 = vmul.f32 %v782_v42, %v523_v33 }
 0x45e   :  { %539 = vst [vmem:[#allocation11 + $0x8] sm:$0xff] %v537_v43 }
 0x45f   :  { %894 = shalt.err (!%p891_p1)
}
 0x460   :  { %551 = dma.vmem_to_hbm [thread:$0]  %s546_s18, 256, %s1028_s9, [#allocation4], %s913_s14, %s913_s14, %s914_s15  }
 0x461   :  { %909 = dma.done.wait [#allocation4], 256  }
 0x462   :  { %910 = vsyncadd [#allocation4], 4294967040 }
 0x463   :  { %555 = vsyncpa [#allocation3], 1 }
 0x464   :  { %556 = vsyncpa [#allocation6], 1 }
 0x465   :  { %557 = vsyncpa [#allocation9], 1 }
 0x466   :  { %558 = vsyncpa [#allocation4], 1 }

</bundles_post_ra>
